<compile_context>
chip_gen: v5e
topology: v5e:2x2
jax: 0.10.0
libtpu: 0.0.40
codegen_flags: <defaults>
</compile_context>

<pallas_src>
import functools

import jax
import jax.numpy as jnp
from jax.experimental import pallas as pl
from jax.experimental.pallas import tpu as pltpu

BERT_DIM = 768          # self.bert_dim in the module
OUTPUT_SIZE = 128       # self.output_size (chosen small, lane-aligned)


def _head_kernel(x_ref, w_ref, b_ref, o_ref):
    """y = dropout(x) @ W + b for one tm-row block; full K and N in one dot.

    Dropout(p=0.1) is inference-mode (identity), matching module.eval().
    # TODO(synk): training-mode dropout would need a seeded
    # pltpu.prng_random_bits mask applied to x before the dot.
    """
    acc = jnp.dot(x_ref[...], w_ref[...], preferred_element_type=jnp.float32)
    o_ref[...] = (acc + b_ref[...]).astype(o_ref.dtype)


@functools.partial(jax.jit, static_argnames=("tm",))
def baseline_head(pooler_output, weight_t, bias, *, tm=None):
    """pooler_output: [B, 768]; weight_t: [768, out]; bias: [1, out]."""
    M, K = pooler_output.shape
    K2, N = weight_t.shape
    assert K == K2 and bias.shape == (1, N)

    # bf16 operands halve the only meaningful HBM traffic (the 768xN weight
    # read) and feed the MXU at its native bf16 rate; accumulate in f32.
    x = pooler_output.astype(jnp.bfloat16)
    w = weight_t.astype(jnp.bfloat16)
    b = bias.astype(jnp.float32)

    # Row-block size: whole batch up to 256 rows, rounded up to a sublane
    # multiple of 8.  Batch sizes not divisible by tm are handled by padding.
    if tm is None:
        tm = min(max(M, 8), 256)
    tm = ((tm + 7) // 8) * 8

    m_pad = pl.cdiv(M, tm) * tm
    if m_pad != M:
        x = jnp.pad(x, ((0, m_pad - M), (0, 0)))

    grid = (m_pad // tm,)

    cost = pl.CostEstimate(
        flops=2 * m_pad * N * K,
        transcendentals=0,
        bytes_accessed=(x.size * x.dtype.itemsize
                        + w.size * w.dtype.itemsize
                        + b.size * b.dtype.itemsize
                        + m_pad * N * 4),
    )

    out = pl.pallas_call(
        _head_kernel,
        out_shape=jax.ShapeDtypeStruct((m_pad, N), jnp.float32),
        grid_spec=pltpu.PrefetchScalarGridSpec(
            num_scalar_prefetch=0,
            grid=grid,
            in_specs=[
                pl.BlockSpec((tm, K), lambda i: (i, 0)),   # x row block, full K
                pl.BlockSpec((K, N), lambda i: (0, 0)),    # whole weight
                pl.BlockSpec((1, N), lambda i: (0, 0)),    # bias row
            ],
            out_specs=pl.BlockSpec((tm, N), lambda i: (i, 0)),
        ),
        compiler_params=pltpu.CompilerParams(
            dimension_semantics=("parallel",),
        ),
        cost_estimate=cost,
    )(x, w, b)

    return out[:M] if m_pad != M else out


if __name__ == "__main__":
    key = jax.random.PRNGKey(0)
    k_x, k_w, k_b = jax.random.split(key, 3)

    batch = 8
    # Stand-in for BERT pooler_output (tokenizer + pretrained BERT are
    # untranslatable; see module docstring above).
    pooler_output = jax.random.normal(k_x, (batch, BERT_DIM), dtype=jnp.float32)

    # Deterministic parameter init for nn.Linear(768, output_size):
    # PyTorch stores weight as [out, in]; we keep the transposed [in, out].
    w_torch_layout = (
        jax.random.normal(k_w, (OUTPUT_SIZE, BERT_DIM), dtype=jnp.float32) * 0.02
    )
    weight_t = jnp.transpose(w_torch_layout)                 # [768, out]
    bias = jax.random.normal(k_b, (1, OUTPUT_SIZE), dtype=jnp.float32) * 0.02

    out = baseline_head(pooler_output, weight_t, bias)
    jax.block_until_ready(out)

    # Correctness check: reference uses the same bf16-rounded operands (the
    # kernel intentionally stores x/W as bf16, accumulating in f32).
    x_ref = pooler_output.astype(jnp.bfloat16).astype(jnp.float32)
    w_ref = weight_t.astype(jnp.bfloat16).astype(jnp.float32)
    ref = (
        jnp.dot(x_ref, w_ref, precision=jax.lax.Precision.HIGHEST) + bias
    )
    assert out.shape == (batch, OUTPUT_SIZE)
    assert jnp.allclose(out, ref, atol=1e-3, rtol=1e-3)

    print("KERNEL_OK")
</pallas_src>

<mosaic_0001>
module attributes {stable_mosaic.version = 11 : i64} {
  func.func @_head_kernel(%arg0: i32, %arg1: memref<8x768xbf16, #tpu.memory_space<vmem>>, %arg2: memref<768x128xbf16, #tpu.memory_space<vmem>>, %arg3: memref<1x128xf32, #tpu.memory_space<vmem>>, %arg4: memref<8x128xf32, #tpu.memory_space<vmem>>) attributes {dimension_semantics = [#tpu.dimension_semantics<parallel>], iteration_bounds = array<i64: 1>, scalar_prefetch = 0 : i64, scratch_operands = 0 : i64, tpu.core_type = #tpu.core_type<tc>, window_params = [{transform_indices = @transform_0, window_bounds = array<i64: 8, 768>}, {pipeline_mode = #tpu.pipeline_mode<synchronous>, transform_indices = @transform_1, window_bounds = array<i64: 768, 128>}, {pipeline_mode = #tpu.pipeline_mode<synchronous>, transform_indices = @transform_2, window_bounds = array<i64: 1, 128>}, {transform_indices = @transform_3, window_bounds = array<i64: 8, 128>}]} {
    %c0 = arith.constant 0 : index
    %c0_0 = arith.constant 0 : index
    %0 = vector.load %arg1[%c0, %c0_0] : memref<8x768xbf16, #tpu.memory_space<vmem>>, vector<8x768xbf16>
    %c0_1 = arith.constant 0 : index
    %c0_2 = arith.constant 0 : index
    %1 = vector.load %arg2[%c0_1, %c0_2] : memref<768x128xbf16, #tpu.memory_space<vmem>>, vector<768x128xbf16>
    %cst = arith.constant dense<0.000000e+00> : vector<8x128xf32>
    %2 = tpu.matmul %0, %1, %cst {dimension_numbers = #tpu.dot_dimension_numbers<[1], [0], [0], [1], [0, 0, 1, 1], [], []>} : vector<8x768xbf16>, vector<768x128xbf16>, vector<8x128xf32> -> vector<8x128xf32>
    %c0_3 = arith.constant 0 : index
    %c0_4 = arith.constant 0 : index
    %3 = vector.load %arg3[%c0_3, %c0_4] : memref<1x128xf32, #tpu.memory_space<vmem>>, vector<1x128xf32>
    %4 = vector.broadcast %3 : vector<1x128xf32> to vector<8x128xf32>
    %5 = arith.addf %2, %4 : vector<8x128xf32>
    %c0_5 = arith.constant 0 : index
    %c0_6 = arith.constant 0 : index
    %6 = vector.load %arg4[%c0_5, %c0_6] : memref<8x128xf32, #tpu.memory_space<vmem>>, vector<8x128xf32>
    tpu.vector_store %arg4[%c0_5, %c0_6], %5 {strides = array<i32>} : memref<8x128xf32, #tpu.memory_space<vmem>>, vector<8x128xf32>,
    return
  }
  func.func @transform_0(%arg0: i32) -> (i32, i32) {
    %c0_i32 = arith.constant 0 : i32
    %c0_i32_0 = arith.constant 0 : i32
    return %arg0, %c0_i32 : i32, i32
  }
  func.func @transform_1(%arg0: i32) -> (i32, i32) {
    %c0_i32 = arith.constant 0 : i32
    %c0_i32_0 = arith.constant 0 : i32
    %c0_i32_1 = arith.constant 0 : i32
    return %c0_i32, %c0_i32_0 : i32, i32
  }
  func.func @transform_2(%arg0: i32) -> (i32, i32) {
    %c0_i32 = arith.constant 0 : i32
    %c0_i32_0 = arith.constant 0 : i32
    %c0_i32_1 = arith.constant 0 : i32
    return %c0_i32, %c0_i32_0 : i32, i32
  }
  func.func @transform_3(%arg0: i32) -> (i32, i32) {
    %c0_i32 = arith.constant 0 : i32
    %c0_i32_0 = arith.constant 0 : i32
    return %arg0, %c0_i32 : i32, i32
  }
}

</mosaic_0001>

<bundles_post_ra>
// kernel: baseline_head.1
= control target key start
LH: loop header
LB: loop body
LE: loop exit
PB: predicated region body
PF: predicated region fallthrough
CT: control target
= control target key end

     0   :  { %s970_s0 = inlined_call_operand.vmem [shape: bf16[8,768], index: 0, kind: input, shape index: {}]   ;;  %s971_s1 = inlined_call_operand.vmem [shape: bf16[768,128], index: 1, kind: input, shape index: {}]   ;;  %s972_s2 = inlined_call_operand.vmem [shape: f32[1,128], index: 2, kind: input, shape index: {}]   ;;  %s973_s3 = inlined_call_operand.hbm [shape: f32[8,128], index: 3, kind: output, shape index: {}]  }
   0x1   :  { %v721_v0 = vld [vmem:[%s971_s1 + $0x38] sm:$0xff]  ;;  %v720_v2 = vld [vmem:[%s971_s1 + $0x30] sm:$0xff]  ;;  %v719_v8 = vld [vmem:[%s971_s1 + $0x28] sm:$0xff] }
   0x2   :  { %v729_v1 = vld [vmem:[%s971_s1 + $0x78] sm:$0xff]  ;;  %427 = vmatpush.bf16.msra.mxu0 %v721_v0  ;;  %v728_v3 = vld [vmem:[%s971_s1 + $0x70] sm:$0xff]  ;;  %v727_v9 = vld [vmem:[%s971_s1 + $0x68] sm:$0xff] }
   0x3   :  { %440 = vmatpush.bf16.msra.mxu1 %v729_v1  ;;  %v737_v4 = vld [vmem:[%s971_s1 + $0xb8] sm:$0xff]  ;;  %v736_v6 = vld [vmem:[%s971_s1 + $0xb0] sm:$0xff]  ;;  %v735_v10 = vld [vmem:[%s971_s1 + $0xa8] sm:$0xff] }
   0x4   :  { %v745_v5 = vld [vmem:[%s971_s1 + $0xf8] sm:$0xff]  ;;  %453 = vmatpush.bf16.msra.mxu2 %v737_v4  ;;  %v744_v7 = vld [vmem:[%s971_s1 + $0xf0] sm:$0xff]  ;;  %v743_v11 = vld [vmem:[%s971_s1 + $0xe8] sm:$0xff] }
   0x5   :  { %466 = vmatpush.bf16.msra.mxu3 %v745_v5  ;;  %v718_v12 = vld [vmem:[%s971_s1 + $0x20] sm:$0xff]  ;;  %v717_v16 = vld [vmem:[%s971_s1 + $0x18] sm:$0xff] }
   0x6   :  { %428 = vmatpush.bf16.msra.mxu0 %v720_v2  ;;  %v726_v13 = vld [vmem:[%s971_s1 + $0x60] sm:$0xff]  ;;  %v725_v17 = vld [vmem:[%s971_s1 + $0x58] sm:$0xff] }
   0x7   :  { %441 = vmatpush.bf16.msra.mxu1 %v728_v3  ;;  %v734_v14 = vld [vmem:[%s971_s1 + $0xa0] sm:$0xff] }
   0x8   :  { %454 = vmatpush.bf16.msra.mxu2 %v736_v6  ;;  %v742_v15 = vld [vmem:[%s971_s1 + $0xe0] sm:$0xff] }
   0x9   :  { %467 = vmatpush.bf16.msra.mxu3 %v744_v7 }
   0xa   :  { %429 = vmatpush.bf16.msra.mxu0 %v719_v8 }
   0xb   :  { %442 = vmatpush.bf16.msra.mxu1 %v727_v9 }
   0xc   :  { %455 = vmatpush.bf16.msra.mxu2 %v735_v10 }
   0xd   :  { %468 = vmatpush.bf16.msra.mxu3 %v743_v11 }
   0xe   :  { %430 = vmatpush.bf16.msra.mxu0 %v718_v12 }
   0xf   :  { %443 = vmatpush.bf16.msra.mxu1 %v726_v13 }
  0x10   :  { %8 = vsyncpa [#allocation3], 0  ;;  %456 = vmatpush.bf16.msra.mxu2 %v734_v14  ;;  %v733_v18 = vld [vmem:[%s971_s1 + $0x98] sm:$0xff]  ;;  %v716_v20 = vld [vmem:[%s971_s1 + $0x10] sm:$0xff]  ;;  %s513_s10 = sshll.u32 %s973_s3, 4  ;;  %s514_s10 = int_to_ptr.hbm [resolvable:$true] %s513_s10 }
  0x11   :  { %469 = vmatpush.bf16.msra.mxu3 %v742_v15  ;;  %v741_v19 = vld [vmem:[%s971_s1 + $0xd8] sm:$0xff]  ;;  %v724_v21 = vld [vmem:[%s971_s1 + $0x50] sm:$0xff]  ;;  %v715_v24 = vld [vmem:[%s971_s1 + $0x8] sm:$0xff] }
  0x12   :  { %431 = vmatpush.bf16.msra.mxu0 %v717_v16  ;;  %v732_v22 = vld [vmem:[%s971_s1 + $0x90] sm:$0xff]  ;;  %v723_v25 = vld [vmem:[%s971_s1 + $0x48] sm:$0xff]  ;;  %v15_v26 = vld [vmem:[%s970_s0] sm:$0xff] }
  0x13   :  { %444 = vmatpush.bf16.msra.mxu1 %v725_v17  ;;  %v740_v23 = vld [vmem:[%s971_s1 + $0xd0] sm:$0xff]  ;;  %v731_v27 = vld [vmem:[%s971_s1 + $0x88] sm:$0xff]  ;;  %v121_v29 = vunpack.c.l.b16 %v15_v26  ;;  %v122_v30 = vunpack.c.h.b16 %v15_v26  ;;  %v714_v32 = vld [vmem:[%s971_s1] sm:$0xff] }
  0x14   :  { %457 = vmatpush.bf16.msra.mxu2 %v733_v18  ;;  %v739_v28 = vld [vmem:[%s971_s1 + $0xc8] sm:$0xff]  ;;  %v722_v33 = vld [vmem:[%s971_s1 + $0x40] sm:$0xff]  ;;  %v753_v34 = vld [vmem:[%s971_s1 + $0x138] sm:$0xff] }
  0x15   :  { %470 = vmatpush.bf16.msra.mxu3 %v741_v19  ;;  %v16_v31 = vld [vmem:[%s970_s0 + $0x8] sm:$0xff]  ;;  %v761_v35 = vld [vmem:[%s971_s1 + $0x178] sm:$0xff]  ;;  %v730_v36 = vld [vmem:[%s971_s1 + $0x80] sm:$0xff]  ;;  %v127_v40 = vpack.c.b16 %v121_v29, %v121_v29  ;;  %v128_v41 = vpack.c.b16 %v122_v30, %v122_v30 }
  0x16   :  { %432 = vmatpush.bf16.msra.mxu0 %v716_v20  ;;  %v738_v37 = vld [vmem:[%s971_s1 + $0xc0] sm:$0xff]  ;;  %v123_v38 = vunpack.c.l.b16 %v16_v31  ;;  %v124_v39 = vunpack.c.h.b16 %v16_v31  ;;  %v752_v42 = vld [vmem:[%s971_s1 + $0x130] sm:$0xff]  ;;  %v751_v46 = vld [vmem:[%s971_s1 + $0x128] sm:$0xff] }
  0x17   :  { %445 = vmatpush.bf16.msra.mxu1 %v724_v21  ;;  %v760_v43 = vld [vmem:[%s971_s1 + $0x170] sm:$0xff]  ;;  %v759_v47 = vld [vmem:[%s971_s1 + $0x168] sm:$0xff]  ;;  %v750_v48 = vld [vmem:[%s971_s1 + $0x120] sm:$0xff] }
  0x18   :  { %458 = vmatpush.bf16.msra.mxu2 %v732_v22  ;;  %v129_v44 = vpack.c.b16 %v123_v38, %v123_v38  ;;  %v130_v45 = vpack.c.b16 %v124_v39, %v124_v39  ;;  %v758_v49 = vld [vmem:[%s971_s1 + $0x160] sm:$0xff]  ;;  %v749_v50 = vld [vmem:[%s971_s1 + $0x118] sm:$0xff]  ;;  %v748_v52 = vld [vmem:[%s971_s1 + $0x110] sm:$0xff] }
  0x19   :  { %471 = vmatpush.bf16.msra.mxu3 %v740_v23  ;;  %v757_v51 = vld [vmem:[%s971_s1 + $0x158] sm:$0xff]  ;;  %v756_v53 = vld [vmem:[%s971_s1 + $0x150] sm:$0xff]  ;;  %v747_v54 = vld [vmem:[%s971_s1 + $0x108] sm:$0xff] }
  0x1a   :  { %433 = vmatpush.bf16.msra.mxu0 %v715_v24  ;;  %v755_v55 = vld [vmem:[%s971_s1 + $0x148] sm:$0xff]  ;;  %v17_v56 = vld [vmem:[%s970_s0 + $0x10] sm:$0xff]  ;;  %v746_v59 = vld [vmem:[%s971_s1 + $0x100] sm:$0xff] }
  0x1b   :  { %446 = vmatpush.bf16.msra.mxu1 %v723_v25  ;;  %v125_v57 = vunpack.c.l.b16 %v17_v56  ;;  %v126_v58 = vunpack.c.h.b16 %v17_v56  ;;  %v754_v60 = vld [vmem:[%s971_s1 + $0x140] sm:$0xff]  ;;  %s790_s1 = smov [#allocation2]  }
  0x1c   :  { %459 = vmatpush.bf16.msra.mxu2 %v731_v27  ;;  %v763_v5 = vld [vmem:[%s972_s2] ss:$0 sm:$0xff]  ;;  %s511_s7 = sshll.u32 %s790_s1, 4  ;;  %s512_s7 = int_to_ptr.vmem [resolvable:$true] %s511_s7 }
  0x1d   :  { %472 = vmatpush.bf16.msra.mxu3 %v739_v28  ;;  %v131_v61 = vpack.c.b16 %v125_v57, %v125_v57  ;;  %v132_v62 = vpack.c.b16 %v126_v58, %v126_v58 }
  0x1e   :  { %434 = vmatpush.bf16.msra.mxu0 %v714_v32 }
  0x1f   :  { %447 = vmatpush.bf16.msra.mxu1 %v722_v33 }
  0x20   :  { %460 = vmatpush.bf16.msra.mxu2 %v730_v36 }
  0x21   :  { %473 = vmatpush.bf16.msra.mxu3 %v738_v37  ;;  %435 = vmatmul.bf16.vlgmr.msra.gmra.mxu0 %v127_v40 }
  0x22   :  { %479 = vmatpush.bf16.msrb.mxu0 %v753_v34  ;;  %448 = vmatmul.bf16.vlgmr.msra.gmra.mxu1 %v128_v41 }
  0x23   :  { %492 = vmatpush.bf16.msrb.mxu1 %v761_v35  ;;  %461 = vmatmul.bf16.vlgmr.msra.gmra.mxu2 %v129_v44 }
  0x24   :  { %474 = vmatmul.bf16.vlgmr.msra.gmra.mxu3 %v130_v45 }
  0x26   :  { %480 = vmatpush.bf16.msrb.mxu0 %v752_v42 }
  0x27   :  { %493 = vmatpush.bf16.msrb.mxu1 %v760_v43 }
  0x2a   :  { %481 = vmatpush.bf16.msrb.mxu0 %v751_v46 }
  0x2b   :  { %494 = vmatpush.bf16.msrb.mxu1 %v759_v47 }
  0x2e   :  { %482 = vmatpush.bf16.msrb.mxu0 %v750_v48 }
  0x2f   :  { %495 = vmatpush.bf16.msrb.mxu1 %v758_v49 }
  0x32   :  { %483 = vmatpush.bf16.msrb.mxu0 %v749_v50 }
  0x33   :  { %496 = vmatpush.bf16.msrb.mxu1 %v757_v51 }
  0x36   :  { %484 = vmatpush.bf16.msrb.mxu0 %v748_v52 }
  0x37   :  { %497 = vmatpush.bf16.msrb.mxu1 %v756_v53 }
  0x3a   :  { %485 = vmatpush.bf16.msrb.mxu0 %v747_v54 }
  0x3b   :  { %498 = vmatpush.bf16.msrb.mxu1 %v755_v55 }
  0x3e   :  { %486 = vmatpush.bf16.msrb.mxu0 %v746_v59 }
  0x3f   :  { %499 = vmatpush.bf16.msrb.mxu1 %v754_v60 }
  0x41   :  { %487 = vmatmul.bf16.vlgmr.msrb.gmra.mxu0 %v131_v61 }
  0x42   :  { %500 = vmatmul.bf16.vlgmr.msrb.gmra.mxu1 %v132_v62 }
  0x9e   :  { %v436_v63 = vpop.f32.mrf.mxu0 }
  0x9f   :  { %v449_v0 = vpop.f32.mrf.mxu1  ;;  %v437_v6 = vadd.f32 %v763_v5, %v436_v63 }
  0xa1   :  { %v450_v9 = vadd.f32 %v449_v0, %v437_v6 }
  0xa6   :  { %v438_v1 = vpop.f32.mrf.mxu0  ;;  %v462_v3 = vpop.f32.mrf.mxu2 }
  0xa7   :  { %v451_v2 = vpop.f32.mrf.mxu1  ;;  %v475_v4 = vpop.f32.mrf.mxu3  ;;  %v463_v10 = vadd.f32 %v462_v3, %v450_v9 }
  0xa9   :  { %v476_v11 = vadd.f32 %v475_v4, %v463_v10 }
  0xae   :  { %v464_v7 = vpop.f32.mrf.mxu2 }
  0xaf   :  { %v477_v8 = vpop.f32.mrf.mxu3 }
  0xbe   :  { %v488_v12 = vpop.f32.mrf.mxu0 }
  0xbf   :  { %v501_v13 = vpop.f32.mrf.mxu1  ;;  %v489_v14 = vadd.f32 %v488_v12, %v476_v11 }
  0xc1   :  { %v502_v15 = vadd.f32 %v501_v13, %v489_v14 }
  0xc3   :  { %505 = vst [vmem:[#allocation2] sm:$0xff] %v502_v15 }
  0xc4   :  { %516 = dma.vmem_to_hbm [thread:$0]  %s512_s7, 128, %s514_s10, [#allocation3]  }
  0xc6   :  { %v490_v16 = vpop.f32.mrf.mxu0 }
  0xc7   :  { %v503_v17 = vpop.f32.mrf.mxu1 }
  0xc8   :  { %788 = dma.done.wait [#allocation3], 128  }
  0xc9   :  { %789 = vsyncadd [#allocation3], 4294967168 }
  0xca   :  { %521 = vsyncpa [#allocation3], 1 }

</bundles_post_ra>
